<compile_context>
chip_gen: v5e
topology: v5e:2x2
jax: 0.10.0
libtpu: 0.0.40
codegen_flags: <defaults>
</compile_context>

<pallas_src>
import functools

import jax
import jax.numpy as jnp
import numpy as np
from jax.experimental import pallas as pl
from jax.experimental.pallas import tpu as pltpu


# ---------------------------------------------------------------- kernel ----

def linear_kernel(x_ref, w_ref, b_ref, out_ref):
    # x_ref  : [tm, k]   (native dtype; bf16 x bf16 -> f32 MXU path if bf16)
    # w_ref  : [k, n]    (weight, already transposed / block-diag packed)
    # b_ref  : [1, n]
    # out_ref: [tm, n]
    y = jnp.dot(x_ref[...], w_ref[...], preferred_element_type=jnp.float32)
    y = y + b_ref[...].astype(jnp.float32)
    out_ref[...] = y.astype(out_ref.dtype)


# --------------------------------------------------------------- wrapper ----

@functools.partial(jax.jit, static_argnames=("tile_rows",))
def template_pair_embedder(x, weight, bias, *, tile_rows=2048):
    """Pallas equivalent of TemplatePairEmbedder.forward.

    Args:
      x:      [*, c_in] input tensor (f32 or bf16).
      weight: [c_out, c_in] Linear weight (PyTorch layout).
      bias:   [c_out] Linear bias.
    Returns:
      [*, c_out] output tensor in x.dtype (f32 accumulation inside).
    """
    c_in = x.shape[-1]
    c_out = weight.shape[0]
    lead = x.shape[:-1]

    m_total = 1
    for d in lead:
        m_total *= int(d)
    m_total = max(m_total, 1)

    x2 = x.reshape(m_total, c_in)

    # Lane-dense output packing: pack `p` logical rows per physical row so the
    # output minor dim becomes a full 128 lanes (unmasked vector stores).
    pack = 1
    if c_out < 128 and 128 % c_out == 0:
        p = 128 // c_out
        if m_total % p == 0:
            pack = p

    if pack > 1:
        x2 = x2.reshape(m_total // pack, pack * c_in)        # free reinterpretation
        w_mat = jnp.kron(jnp.eye(pack, dtype=weight.dtype), weight.T)  # block-diag
        b_row = jnp.tile(bias, pack).reshape(1, pack * c_out)
    else:
        w_mat = weight.T                                      # [c_in, c_out]
        b_row = bias.reshape(1, c_out)

    n_rows, k = x2.shape
    n_out = w_mat.shape[1]

    # Row tile: multiple of 8 (sublane), as large as possible (per-step-overhead
    # amortization) but never larger than the array; ragged last block handled
    # by Pallas write clipping.  Prefer >=2 blocks so both v7x TCs get work.
    if n_rows >= 8:
        tm = min(int(tile_rows), (n_rows // 8) * 8)
        if -(-n_rows // tm) < 2 and n_rows >= 16:
            tm = max(8, (n_rows // 16) * 8)
    else:
        tm = n_rows

    grid = (-(-n_rows // tm),)

    out = pl.pallas_call(
        linear_kernel,
        out_shape=jax.ShapeDtypeStruct((n_rows, n_out), x.dtype),
        grid_spec=pltpu.PrefetchScalarGridSpec(
            num_scalar_prefetch=0,
            grid=grid,
            in_specs=[
                pl.BlockSpec((tm, k), lambda i: (i, 0)),        # x rows (streamed)
                pl.BlockSpec((k, n_out), lambda i: (0, 0)),     # weight (resident)
                pl.BlockSpec((1, n_out), lambda i: (0, 0)),     # bias (resident)
            ],
            out_specs=pl.BlockSpec((tm, n_out), lambda i: (i, 0)),
        ),
        compiler_params=pltpu.CompilerParams(
            dimension_semantics=("parallel",),
        ),
    )(x2, w_mat, b_row)

    # Row-major reinterpretation back to [*, c_out] (also undoes the packing).
    return out.reshape(lead + (c_out,))


# ------------------------------------------------------------- reference ----

def reference(x, weight, bias):
    return jnp.einsum("...i,oi->...o", x, weight) + bias


# ------------------------------------------------------------------ main ----

if __name__ == "__main__":
    # Shapes consistent with OpenFold's template pair embedder:
    # template_pair_feat is [N_templ, N_res, N_res, c_in]; c_in=88, c_out=c_t=64.
    c_in, c_out = 88, 64

    key = jax.random.PRNGKey(0)
    k_x1, k_x2, k_w, k_b = jax.random.split(key, 4)

    weight = 0.1 * jax.random.normal(k_w, (c_out, c_in), jnp.float32)
    bias = 0.1 * jax.random.normal(k_b, (c_out,), jnp.float32)

    # Case 1: even row count (M=128) -> lane-dense packed path (128-wide output).
    x1 = jax.random.normal(k_x1, (2, 8, 8, c_in), jnp.float32)
    y1 = template_pair_embedder(x1, weight, bias)
    jax.block_until_ready(y1)
    np.testing.assert_allclose(np.asarray(y1), np.asarray(reference(x1, weight, bias)),
                               rtol=1e-5, atol=1e-5)

    # Case 2: odd row count (M=49), tile doesn't divide M -> unpacked fallback
    # + ragged last block (exercises write clipping, no pad/slice passes).
    x2 = jax.random.normal(k_x2, (1, 7, 7, c_in), jnp.float32)
    y2 = template_pair_embedder(x2, weight, bias)
    jax.block_until_ready(y2)
    np.testing.assert_allclose(np.asarray(y2), np.asarray(reference(x2, weight, bias)),
                               rtol=1e-5, atol=1e-5)

    # Case 3: bf16 end-to-end (halves HBM traffic; f32 accumulation inside).
    xb = x1.astype(jnp.bfloat16)
    wb = weight.astype(jnp.bfloat16)
    bb = bias.astype(jnp.bfloat16)
    yb = template_pair_embedder(xb, wb, bb)
    jax.block_until_ready(yb)
    np.testing.assert_allclose(
        np.asarray(yb, dtype=np.float32),
        np.asarray(reference(xb.astype(jnp.float32), wb.astype(jnp.float32),
                             bb.astype(jnp.float32))),
        rtol=5e-2, atol=5e-2)

    print("KERNEL_OK")
</pallas_src>

<mosaic_0001>
module attributes {stable_mosaic.version = 11 : i64} {
  func.func @linear_kernel(%arg0: i32, %arg1: memref<32x176xf32, #tpu.memory_space<vmem>>, %arg2: memref<176x128xf32, #tpu.memory_space<vmem>>, %arg3: memref<1x128xf32, #tpu.memory_space<vmem>>, %arg4: memref<32x128xf32, #tpu.memory_space<vmem>>) attributes {dimension_semantics = [#tpu.dimension_semantics<parallel>], iteration_bounds = array<i64: 2>, scalar_prefetch = 0 : i64, scratch_operands = 0 : i64, tpu.core_type = #tpu.core_type<tc>, window_params = [{transform_indices = @transform_0, window_bounds = array<i64: 32, 176>}, {pipeline_mode = #tpu.pipeline_mode<synchronous>, transform_indices = @transform_1, window_bounds = array<i64: 176, 128>}, {pipeline_mode = #tpu.pipeline_mode<synchronous>, transform_indices = @transform_2, window_bounds = array<i64: 1, 128>}, {transform_indices = @transform_3, window_bounds = array<i64: 32, 128>}]} {
    %c0 = arith.constant 0 : index
    %c0_0 = arith.constant 0 : index
    %0 = vector.load %arg1[%c0, %c0_0] : memref<32x176xf32, #tpu.memory_space<vmem>>, vector<32x176xf32>
    %c0_1 = arith.constant 0 : index
    %c0_2 = arith.constant 0 : index
    %1 = vector.load %arg2[%c0_1, %c0_2] : memref<176x128xf32, #tpu.memory_space<vmem>>, vector<176x128xf32>
    %cst = arith.constant dense<0.000000e+00> : vector<32x128xf32>
    %2 = tpu.matmul %0, %1, %cst {dimension_numbers = #tpu.dot_dimension_numbers<[1], [0], [0], [1], [0, 0, 1, 1], [], []>} : vector<32x176xf32>, vector<176x128xf32>, vector<32x128xf32> -> vector<32x128xf32>
    %c0_3 = arith.constant 0 : index
    %c0_4 = arith.constant 0 : index
    %3 = vector.load %arg3[%c0_3, %c0_4] : memref<1x128xf32, #tpu.memory_space<vmem>>, vector<1x128xf32>
    %4 = vector.broadcast %3 : vector<1x128xf32> to vector<32x128xf32>
    %5 = arith.addf %2, %4 : vector<32x128xf32>
    %c0_5 = arith.constant 0 : index
    %c0_6 = arith.constant 0 : index
    %6 = vector.load %arg4[%c0_5, %c0_6] : memref<32x128xf32, #tpu.memory_space<vmem>>, vector<32x128xf32>
    tpu.vector_store %arg4[%c0_5, %c0_6], %5 {strides = array<i32>} : memref<32x128xf32, #tpu.memory_space<vmem>>, vector<32x128xf32>,
    return
  }
  func.func @transform_0(%arg0: i32) -> (i32, i32) {
    %c0_i32 = arith.constant 0 : i32
    %c0_i32_0 = arith.constant 0 : i32
    return %arg0, %c0_i32 : i32, i32
  }
  func.func @transform_1(%arg0: i32) -> (i32, i32) {
    %c0_i32 = arith.constant 0 : i32
    %c0_i32_0 = arith.constant 0 : i32
    %c0_i32_1 = arith.constant 0 : i32
    return %c0_i32, %c0_i32_0 : i32, i32
  }
  func.func @transform_2(%arg0: i32) -> (i32, i32) {
    %c0_i32 = arith.constant 0 : i32
    %c0_i32_0 = arith.constant 0 : i32
    %c0_i32_1 = arith.constant 0 : i32
    return %c0_i32, %c0_i32_0 : i32, i32
  }
  func.func @transform_3(%arg0: i32) -> (i32, i32) {
    %c0_i32 = arith.constant 0 : i32
    %c0_i32_0 = arith.constant 0 : i32
    return %arg0, %c0_i32 : i32, i32
  }
}

</mosaic_0001>

<bundles_post_ra>
// kernel: tile.8
= control target key start
LH: loop header
LB: loop body
LE: loop exit
PB: predicated region body
PF: predicated region fallthrough
CT: control target
= control target key end

     0   :  { %s22_s0 = inlined_call_operand.vmem [shape: f32[64], index: 0, kind: input, shape index: {}]   ;;  %s23_s1 = inlined_call_operand.vmem [shape: f32[2,64], index: 1, kind: output, shape index: {}]  }
   0x1   :  { %v4_v0 = vld [vmem:[%s22_s0] ss:$0 sm:$0xff] }
   0x2   :  { %5 = vst [vmem:[%s23_s1] sm:$0x3] %v4_v0 }

// kernel: tile.9
= control target key start
LH: loop header
LB: loop body
LE: loop exit
PB: predicated region body
PF: predicated region fallthrough
CT: control target
= control target key end

     0   :  { %vm7_vm0 = vcmask 523264   ;;  %vm13_vm1 = vcmask 1048064   ;;  %s39_s0 = inlined_call_operand.vmem [shape: f32[2,64], index: 0, kind: input, shape index: {}]   ;;  %s40_s1 = inlined_call_operand.vmem [shape: f32[1,128], index: 1, kind: output, shape index: {}]  }
   0x1   :  { %v4_v0 = vld [vmem:[%s39_s0] sm:$0x3]  ;;  %s22_s0 = smov 64  }
   0x2   :  { %5 = vst [vmem:[#allocation1] sm:$0x3] %v4_v0 }
   0x9   :  { %v10_v1 = vld [vmem:[#allocation1 + $0x1] sm:$0x1]   ;;  %v6_v2 = vld [vmem:[#allocation1] sm:$0x1]  }
   0xa   :  { %11 = vrot.lane.b32.xlu0 %v10_v1, %s22_s0  ;;  %8 = vst.msk [vmem:[#allocation0] sm:$0x1] %vm7_vm0, %v6_v2  }
  0x7c   :  { %v12_v3 = vpop.permute.xlu0 %11  }
  0x7d   :  { %14 = vst.msk [vmem:[#allocation0] sm:$0x1] %vm13_vm1, %v12_v3  }
  0x84   :  { %v17_v4 = vld [vmem:[#allocation0] sm:$0x1] }
  0x85   :  { %20 = vst [vmem:[%s40_s1] sm:$0x1] %v17_v4 }

// kernel: template_pair_embedder.1
= control target key start
LH: loop header
LB: loop body
LE: loop exit
PB: predicated region body
PF: predicated region fallthrough
CT: control target
= control target key end

     0   :  { %s428_s12 = smov 0   ;;  %s532_s0 = inlined_call_operand.vmem [shape: f32[64,176], index: 0, kind: input, shape index: {}]   ;;  %s533_s1 = inlined_call_operand.vmem [shape: f32[176,128], index: 1, kind: input, shape index: {}]   ;;  %s534_s2 = inlined_call_operand.vmem [shape: f32[1,128], index: 2, kind: input, shape index: {}]   ;;  %s535_s3 = inlined_call_operand.vmem [shape: f32[64,128], index: 3, kind: output, shape index: {}]  }
   0x1 LB: > { %s342_s13 = sadd.s32 4294967295, %s406_s12   ;;  %p346_p0 = scmp.ge.s32.totalorder %s406_s12, 1  ;;  %s406_s12 = sphi %s428_s12, %s13_s12  }
   0x2   : > { %p139_p1 = scmp.lt.s32.totalorder %s406_s12, 3 }
   0x4   : > { %p140_p2 = pnand %p346_p0, %p139_p1 }
   0x5   : > { %s347_s18 = sshll.u32 (!%p140_p2), %s342_s13, 2 }
   0x6   : > { %143 = sbr.rel (%p140_p2) target bundleno = 189 (0xbd), region = 32  ;;  %p165_p3 = scmp.lt.s32.totalorder (!%p140_p2), %s347_s18, 7 }
   0xb   : > { %v200_v0 = vld [vmem:[%s533_s1 + $0x78] sm:$0xff]  ;;  %v199_v1 = vld [vmem:[%s533_s1 + $0x70] sm:$0xff]  ;;  %v198_v2 = vld [vmem:[%s533_s1 + $0x68] sm:$0xff]  ;;  %s537_s18 = smov (!%p165_p3, %s347_s18), 7  ;;  %vm211_vm0 = vcmask 392192  }
   0xc   : > { %224 = vmatpush.msra.mxu0 %v200_v0  ;;  %359 = vmatpush.msra.mxu2 %v200_v0  ;;  %v206_v3 = vld [vmem:[%s533_s1 + $0xa8] sm:$0xff]  ;;  %v205_v4 = vld [vmem:[%s533_s1 + $0xa0] sm:$0xff]  ;;  %v204_v6 = vld [vmem:[%s533_s1 + $0x98] sm:$0xff]  ;;  %s358_s6 = sshll.u32 %s537_s18, 4  ;;  %s351_s14 = sshll.u32 %s537_s18, 3 }
   0xd   : > { %360 = vmatpush.msra.mxu3 %v200_v0  ;;  %v197_v5 = vld [vmem:[%s533_s1 + $0x60] sm:$0xff]  ;;  %263 = vmatpush.msra.mxu1 %v206_v3  ;;  %v196_v7 = vld [vmem:[%s533_s1 + $0x58] sm:$0xff]  ;;  %v203_v8 = vld [vmem:[%s533_s1 + $0x90] sm:$0xff]  ;;  %s478_s16 = scalar_lea.vmem %s532_s0, %s358_s6  ;;  %s175_s19 = scalar_lea.vmem %s535_s3, %s351_s14 }
   0xe   : > { %225 = vmatpush.msra.mxu0 %v199_v1  ;;  %361 = vmatpush.msra.mxu2 %v199_v1  ;;  %v195_v9 = vld [vmem:[%s533_s1 + $0x50] sm:$0xff]  ;;  %v202_v10 = vld [vmem:[%s533_s1 + $0x88] sm:$0xff]  ;;  %v201_v12 = vld [vmem:[%s533_s1 + $0x80] sm:$0xff] }
   0xf   : > { %362 = vmatpush.msra.mxu3 %v199_v1  ;;  %264 = vmatpush.msra.mxu1 %v205_v4  ;;  %v194_v11 = vld [vmem:[%s533_s1 + $0x48] sm:$0xff]  ;;  %v193_v13 = vld [vmem:[%s533_s1 + $0x40] sm:$0xff]  ;;  %v192_v15 = vld [vmem:[%s533_s1 + $0x38] sm:$0xff] }
  0x10   : > { %226 = vmatpush.msra.mxu0 %v198_v2  ;;  %363 = vmatpush.msra.mxu2 %v198_v2  ;;  %v178_v14 = vld [vmem:[%s478_s16 + $0x8] sm:$0xff]  ;;  %v191_v16 = vld [vmem:[%s533_s1 + $0x30] sm:$0xff]  ;;  %v189_v18 = vld [vmem:[%s533_s1 + $0x20] sm:$0xff] }
  0x11   : > { %364 = vmatpush.msra.mxu3 %v198_v2  ;;  %265 = vmatpush.msra.mxu1 %v204_v6  ;;  %v190_v17 = vld [vmem:[%s533_s1 + $0x28] sm:$0xff]  ;;  %v180_v19 = vld [vmem:[%s478_s16 + $0x18] sm:$0xff]  ;;  %v187_v21 = vld [vmem:[%s533_s1 + $0x10] sm:$0xff] }
  0x12   : > { %227 = vmatpush.msra.mxu0 %v197_v5  ;;  %365 = vmatpush.msra.mxu2 %v197_v5  ;;  %v188_v20 = vld [vmem:[%s533_s1 + $0x18] sm:$0xff]  ;;  %v186_v22 = vld [vmem:[%s533_s1 + $0x8] sm:$0xff]  ;;  %v185_v23 = vld [vmem:[%s533_s1] sm:$0xff] }
  0x13   : > { %366 = vmatpush.msra.mxu3 %v197_v5  ;;  %266 = vmatpush.msra.mxu1 %v203_v8  ;;  %v177_v24 = vld [vmem:[%s478_s16] sm:$0xff]  ;;  %v179_v25 = vld [vmem:[%s478_s16 + $0x10] sm:$0xff]  ;;  %v182_v27 = vld [vmem:[%s478_s16 + $0x28] sm:$0xff] }
  0x14   : > { %228 = vmatpush.msra.mxu0 %v196_v7  ;;  %367 = vmatpush.msra.mxu2 %v196_v7  ;;  %v181_v26 = vld [vmem:[%s478_s16 + $0x20] sm:$0xff]  ;;  %v183_v28 = vld [vmem:[%s478_s16 + $0x30] sm:$0xff]  ;;  %v184_v29 = vld [vmem:[%s478_s16 + $0x38] sm:$0xff] }
  0x15   : > { %368 = vmatpush.msra.mxu3 %v196_v7  ;;  %267 = vmatpush.msra.mxu1 %v202_v10  ;;  %v399_v32 = vld [vmem:[%s534_s2] ss:$0 sm:$0xff] }
  0x16   : > { %229 = vmatpush.msra.mxu0 %v195_v9  ;;  %369 = vmatpush.msra.mxu2 %v195_v9 }
  0x17   : > { %370 = vmatpush.msra.mxu3 %v195_v9  ;;  %268 = vmatpush.msra.mxu1 %v201_v12 }
  0x18   : > { %230 = vmatpush.msra.mxu0 %v194_v11  ;;  %371 = vmatpush.msra.mxu2 %v194_v11 }
  0x19   : > { %372 = vmatpush.msra.mxu3 %v194_v11  ;;  %352 = vmatmul.msk.f32.vlgmr.msra.gmra.mxu1 %vm211_vm0, %v178_v14 }
  0x1a   : > { %231 = vmatpush.msra.mxu0 %v193_v13  ;;  %373 = vmatpush.msra.mxu2 %v193_v13 }
  0x1b   : > { %374 = vmatpush.msra.mxu3 %v193_v13 }
  0x1c   : > { %232 = vmatpush.msra.mxu0 %v192_v15  ;;  %375 = vmatpush.msra.mxu2 %v192_v15 }
  0x1d   : > { %376 = vmatpush.msra.mxu3 %v192_v15 }
  0x1e   : > { %233 = vmatpush.msra.mxu0 %v191_v16  ;;  %377 = vmatpush.msra.mxu2 %v191_v16 }
  0x1f   : > { %378 = vmatpush.msra.mxu3 %v191_v16 }
  0x20   : > { %234 = vmatpush.msra.mxu0 %v190_v17  ;;  %379 = vmatpush.msra.mxu2 %v190_v17 }
  0x21   : > { %380 = vmatpush.msra.mxu3 %v190_v17  ;;  %353 = vmatmul.msk.f32.gmra.mxu1 %vm211_vm0, %v180_v19 }
  0x22   : > { %235 = vmatpush.msra.mxu0 %v189_v18  ;;  %381 = vmatpush.msra.mxu2 %v189_v18 }
  0x23   : > { %382 = vmatpush.msra.mxu3 %v189_v18 }
  0x24   : > { %236 = vmatpush.msra.mxu0 %v188_v20  ;;  %383 = vmatpush.msra.mxu2 %v188_v20 }
  0x25   : > { %384 = vmatpush.msra.mxu3 %v188_v20 }
  0x26   : > { %237 = vmatpush.msra.mxu0 %v187_v21  ;;  %385 = vmatpush.msra.mxu2 %v187_v21 }
  0x27   : > { %386 = vmatpush.msra.mxu3 %v187_v21 }
  0x28   : > { %238 = vmatpush.msra.mxu0 %v186_v22  ;;  %387 = vmatpush.msra.mxu2 %v186_v22 }
  0x29   : > { %388 = vmatpush.msra.mxu3 %v186_v22  ;;  %354 = vmatmul.msk.f32.gmra.mxu1 %vm211_vm0, %v182_v27 }
  0x2a   : > { %239 = vmatpush.msra.mxu0 %v185_v23  ;;  %389 = vmatpush.msra.mxu2 %v185_v23 }
  0x2b   : > { %390 = vmatpush.msra.mxu3 %v185_v23  ;;  %240 = vmatmul.f32.vlgmr.msra.gmra.mxu0 %v177_v24 }
  0x2c   : > { %243 = vmatmul.f32.vlgmr.msra.gmra.mxu2 %v179_v25  ;;  %246 = vmatmul.f32.vlgmr.msra.gmra.mxu3 %v181_v26 }
  0x31   : > { %355 = vmatmul.msk.f32.gmra.mxu1 %vm211_vm0, %v184_v29 }
  0x34   : > { %249 = vmatmul.f32.gmra.mxu3 %v183_v28 }
  0x96   : > { %v270_v30 = vpop.f32.mrf.mxu1 }
  0x9e   : > { %v273_v31 = vpop.f32.mrf.mxu1 }
  0xa6   : > { %v276_v36 = vpop.f32.mrf.mxu1 }
  0xa8   : > { %v241_v33 = vpop.f32.mrf.mxu0 }
  0xa9   : > { %v242_v34 = vadd.f32 %v399_v32, %v241_v33 }
  0xab   : > { %v271_v35 = vadd.f32 %v270_v30, %v242_v34 }
  0xad   : > { %282 = vst [vmem:[%s175_s19] sm:$0xff] %v271_v35 }
  0xae   : > { %v279_v44 = vpop.f32.mrf.mxu1 }
  0xaf   : > { %v244_v37 = vpop.f32.mrf.mxu2  ;;  %v247_v38 = vpop.f32.mrf.mxu3 }
  0xb0   : > { %v245_v39 = vadd.f32 %v399_v32, %v244_v37  ;;  %v248_v40 = vadd.f32 %v399_v32, %v247_v38 }
  0xb2   : > { %v274_v41 = vadd.f32 %v273_v31, %v245_v39  ;;  %v277_v42 = vadd.f32 %v276_v36, %v248_v40 }
  0xb4   : > { %283 = vst [vmem:[%s175_s19 + $0x8] sm:$0xff] %v274_v41 }
  0xb5   : > { %284 = vst [vmem:[%s175_s19 + $0x10] sm:$0xff] %v277_v42 }
  0xb7   : > { %v250_v43 = vpop.f32.mrf.mxu3 }
  0xb8   : > { %v251_v45 = vadd.f32 %v399_v32, %v250_v43 }
  0xba   : > { %v280_v46 = vadd.f32 %v279_v44, %v251_v45 }
  0xbc   : > { %285 = vst [vmem:[%s175_s19 + $0x18] sm:$0xff] %v280_v46 }
  0xbd PF: > { %s13_s12 = sadd.s32 1, %s406_s12  }
  0xbe   : > { %p10_p4 = scmp.ge.s32.totalorder %s13_s12, 4  }
  0xc0   :  { %12 = sbr.rel (!%p10_p4) target bundleno = 1 (0x1), region = 62 }

</bundles_post_ra>
